<compile_context>
chip_gen: v5e
topology: v5e:2x2
jax: 0.10.0
libtpu: 0.0.40
codegen_flags: <defaults>
</compile_context>

<pallas_src>
import functools
import math

import jax
import jax.numpy as jnp
from jax.experimental import pallas as pl
from jax.experimental.pallas import tpu as pltpu


def _eq_conv1d_kernel(x_ref, w_ref, b_ref, o_ref, *, k_eff, stride, c_in, tl, fuse_taps):
    """x_ref: (stride*C_in, WIN)  per-tile windowed, phase-decomposed activations (compute dtype)
    w_ref: (C_out, K_eff*C_in) weights with equalized-LR scale folded in (compute dtype)
    b_ref: (C_out, 1) float32 bias
    o_ref: (C_out, TL) output tile (lane axis = output length -> dense stores)."""
    # Per-tap contiguous windows: tap k == phase (k % stride), offset (k // stride).
    taps = []
    for k in range(k_eff):
        p, q = k % stride, k // stride
        taps.append(x_ref[p * c_in:(p + 1) * c_in, q:q + tl])

    if fuse_taps and k_eff > 1:
        # im2col: one MXU pass, contraction depth K_eff*C_in (only used for small C_in).
        xcol = jnp.concatenate(taps, axis=0)                      # (K_eff*C_in, TL)
        acc = jnp.dot(w_ref[...], xcol, preferred_element_type=jnp.float32)
    else:
        # Per-tap accumulate: no concat copy; MXU accumulates (in-place via MRB on v7x).
        acc = jnp.zeros(o_ref.shape, jnp.float32)
        for k in range(k_eff):
            wk = w_ref[:, k * c_in:(k + 1) * c_in]                # (C_out, C_in)
            acc = acc + jnp.dot(wk, taps[k], preferred_element_type=jnp.float32)

    o_ref[...] = (acc + b_ref[...]).astype(o_ref.dtype)           # bias unscaled, f32 add


def _device_kind():
    try:
        return jax.devices()[0].device_kind.lower()
    except Exception:
        return ""


def equalized_conv1d(x_ncw, weights, bias, *, stride=1, padding=0, downscale=False,
                     compute_dtype=jnp.bfloat16, out_dtype=jnp.float32,
                     length_tile=1024, fuse_taps=None):
    """x_ncw: (N, C_in, L); weights: (C_out, C_in, K); bias: (C_out,).
    Returns (N, C_out, L_out) in out_dtype (default float32, matching PyTorch)."""
    n, in_c, length = x_ncw.shape
    out_c, in_c_w, k_size = weights.shape
    assert in_c == in_c_w, "channel mismatch"
    assert stride >= 1 and padding >= 0

    # fan-in uses the ORIGINAL kernel_size (matches the PyTorch module even when downscale=True)
    scale = float(math.sqrt(2.0) / math.sqrt(k_size * in_c))

    if downscale:
        w = jnp.pad(weights, ((0, 0), (0, 0), (1, 1)))
        w = (w[:, :, :-1] + w[:, :, 1:]) / 2.0            # averaged adjacent taps, K_eff = K + 1
    else:
        w = weights
    k_eff = w.shape[-1]

    # Fold the equalized-LR scale into the (tiny) weight tensor; flatten taps k-major:
    # w_flat[o, k*C_in + c] == w[o, c, k] * scale
    w_flat = (jnp.transpose(w, (0, 2, 1)).reshape(out_c, k_eff * in_c) * scale).astype(compute_dtype)
    b_col = bias.reshape(out_c, 1).astype(jnp.float32)

    # Activations: a single cast to the compute dtype (no f32 round-trip), then conv padding.
    x = x_ncw.astype(compute_dtype)
    if padding > 0:
        x = jnp.pad(x, ((0, 0), (0, 0), (padding, padding)))
    l_pad = length + 2 * padding
    l_out = (l_pad - k_eff) // stride + 1
    assert l_out > 0, "empty output"

    # Output-length tiling: lane-dense output tiles of TL columns.
    if l_out > length_tile:
        tl = max(128, (length_tile // 128) * 128)
    else:
        tl = l_out
    num_t = -(-l_out // tl)

    # Halo needed along the phase-decomposed L axis.
    q_max = (k_eff - 1) // stride
    if num_t == 1:
        win = tl + q_max                          # single full-width window
    elif q_max == 0:
        win = tl                                  # plain non-overlapping tiles
    else:
        win = tl + (-(-q_max // 128)) * 128       # halo rounded up to a lane tile
    l_prime = (num_t - 1) * tl + win              # phase-domain length the windows cover

    # Phase decomposition: x_ph[n, p*C_in + c, i] = x[n, c, i*stride + p]
    # (identity for stride == 1) so every in-kernel tap load is a contiguous lane window.
    l_total = l_prime * stride
    if l_total > l_pad:
        x = jnp.pad(x, ((0, 0), (0, 0), (0, l_total - l_pad)))
    elif l_total < l_pad:
        x = x[:, :, :l_total]
    if stride == 1:
        x_ph = x
    else:
        x_ph = (x.reshape(n, in_c, l_prime, stride)
                  .transpose(0, 3, 1, 2)
                  .reshape(n, stride * in_c, l_prime))

    kind = _device_kind()

    # Fuse all taps into one dot only when the per-tap contraction (C_in) underfills the MXU
    # and the im2col slabs are sublane/lane aligned.  On v7x the MRB accumulates per-tap dots
    # in place, so skip the per-step concat copy entirely.
    if fuse_taps is None:
        pack = 16 if jnp.dtype(compute_dtype).itemsize == 2 else 8
        if "v7" in kind or "tpu7" in kind:
            fuse_taps = False
        else:
            mxu_depth = 128 if any(v in kind for v in ("v2", "v3", "v4", "v5")) else 256
            fuse_taps = (k_eff > 1 and in_c < mxu_depth
                         and in_c % pack == 0 and tl % 128 == 0)
    fuse_taps = bool(fuse_taps)

    # Input BlockSpec: halo-tiled along L -> VMEM bounded by O(TL) regardless of sequence length.
    if num_t == 1:
        x_spec = pl.BlockSpec((None, stride * in_c, win), lambda b, t: (b, 0, 0))
    elif win == tl:
        x_spec = pl.BlockSpec((None, stride * in_c, tl), lambda b, t: (b, 0, t))
    else:
        # Overlapping (TL + halo) windows advancing by TL: element-indexed L dimension.
        x_spec = pl.BlockSpec((None, stride * in_c, pl.Element(win)),
                              lambda b, t: (b, 0, t * tl))

    # Scoped-VMEM limit from the actual (double-buffered) footprint, capped at ~75% of physical.
    try:
        vmem_phys = pltpu.get_tpu_info().vmem_capacity_bytes
    except Exception:
        vmem_phys = 128 * 1024 * 1024
    csize = jnp.dtype(compute_dtype).itemsize
    osize = jnp.dtype(out_dtype).itemsize
    need = 2 * (stride * in_c * win * csize            # x window (double-buffered)
                + out_c * k_eff * in_c * csize         # weights
                + out_c * 4                            # bias
                + out_c * tl * osize)                  # output tile
    need += out_c * tl * 4                             # f32 accumulator
    if fuse_taps:
        need += k_eff * in_c * tl * csize              # im2col temp
    vmem_limit = max(32 << 20, min((vmem_phys * 3) // 4, int(need * 1.5) + (8 << 20)))

    kernel = functools.partial(_eq_conv1d_kernel, k_eff=k_eff, stride=stride,
                               c_in=in_c, tl=tl, fuse_taps=fuse_taps)

    return pl.pallas_call(
        kernel,
        # Exact L_out: the ragged last tile is masked on writeback (no pad-then-slice pass).
        out_shape=jax.ShapeDtypeStruct((n, out_c, l_out), out_dtype),
        grid=(n, num_t),
        in_specs=[
            x_spec,
            pl.BlockSpec((out_c, k_eff * in_c), lambda b, t: (0, 0)),
            pl.BlockSpec((out_c, 1), lambda b, t: (0, 0)),
        ],
        out_specs=pl.BlockSpec((None, out_c, tl), lambda b, t: (b, 0, t)),
        compiler_params=pltpu.CompilerParams(
            dimension_semantics=("parallel", "parallel"),
            vmem_limit_bytes=int(vmem_limit),
        ),
    )(x_ph, w_flat, b_col)


def _reference(x, weights, bias, *, stride, padding, downscale):
    """Pure-JAX f32 reference with identical semantics (lax conv)."""
    out_c, in_c, k_size = weights.shape
    scale = math.sqrt(2.0) / math.sqrt(k_size * in_c)
    if downscale:
        w = jnp.pad(weights, ((0, 0), (0, 0), (1, 1)))
        w = (w[:, :, :-1] + w[:, :, 1:]) / 2.0
    else:
        w = weights
    y = jax.lax.conv_general_dilated(
        x.astype(jnp.float32), (w * scale).astype(jnp.float32),
        window_strides=(stride,), padding=[(padding, padding)],
        dimension_numbers=("NCH", "OIH", "NCH"))
    return y + bias.astype(jnp.float32)[None, :, None]


if __name__ == "__main__":
    key = jax.random.PRNGKey(0)
    k1, k2, k3, k4 = jax.random.split(key, 4)

    # --- case 1: small exact-f32 check, stride=1 (per-tap path, single tile) ---
    x = jax.random.normal(k1, (2, 4, 16), dtype=jnp.float32)
    w = jax.random.normal(k2, (8, 4, 3), dtype=jnp.float32)   # torch.nn.init.normal_
    b = jnp.zeros((8,), dtype=jnp.float32)                    # torch bias init = 0
    out1 = equalized_conv1d(x, w, b, stride=1, padding=1, downscale=False,
                            compute_dtype=jnp.float32)
    jax.block_until_ready(out1)
    ref1 = _reference(x, w, b, stride=1, padding=1, downscale=False)
    assert out1.shape == ref1.shape
    assert jnp.allclose(out1, ref1, atol=1e-4, rtol=1e-4), "mismatch (case 1)"

    # --- case 2: downscale weight-averaging + stride=2 (phase-decomposition path), f32 ---
    b2 = jax.random.normal(k3, (8,), dtype=jnp.float32) * 0.1
    out2 = equalized_conv1d(x, w, b2, stride=2, padding=1, downscale=True,
                            compute_dtype=jnp.float32)
    jax.block_until_ready(out2)
    ref2 = _reference(x, w, b2, stride=2, padding=1, downscale=True)
    assert out2.shape == ref2.shape
    assert jnp.allclose(out2, ref2, atol=1e-4, rtol=1e-4), "mismatch (case 2)"

    # --- case 3: multi-tile grid, halo (Element) windows, ragged last tile, bf16 streams ---
    x3 = jax.random.normal(k1, (2, 16, 640), dtype=jnp.float32)
    w3 = jax.random.normal(k2, (32, 16, 3), dtype=jnp.float32)
    b3 = jax.random.normal(k4, (32,), dtype=jnp.float32) * 0.1
    out3 = equalized_conv1d(x3, w3, b3, stride=1, padding=1, downscale=False,
                            length_tile=256)                     # bf16 compute, f32 out
    jax.block_until_ready(out3)
    ref3 = _reference(x3, w3, b3, stride=1, padding=1, downscale=False)
    assert out3.shape == ref3.shape
    max_err3 = float(jnp.max(jnp.abs(out3 - ref3)))
    assert max_err3 < 1e-1, f"mismatch (case 3, bf16), max_err={max_err3}"

    # --- case 4: stride=2 + downscale, multi-tile halo path, bf16 compute AND bf16 output ---
    x4 = jax.random.normal(k3, (2, 8, 512), dtype=jnp.float32)
    w4 = jax.random.normal(k4, (16, 8, 3), dtype=jnp.float32)
    b4 = jax.random.normal(k2, (16,), dtype=jnp.float32) * 0.1
    out4 = equalized_conv1d(x4, w4, b4, stride=2, padding=1, downscale=True,
                            length_tile=128, out_dtype=jnp.bfloat16)
    jax.block_until_ready(out4)
    ref4 = _reference(x4, w4, b4, stride=2, padding=1, downscale=True)
    assert out4.shape == ref4.shape
    max_err4 = float(jnp.max(jnp.abs(out4.astype(jnp.float32) - ref4)))
    assert max_err4 < 2.5e-1, f"mismatch (case 4, bf16 out), max_err={max_err4}"

    print("KERNEL_OK")
</pallas_src>

<mosaic_0001>
module attributes {stable_mosaic.version = 11 : i64} {
  func.func @_eq_conv1d_kernel(%arg0: i32, %arg1: i32, %arg2: memref<1x4x18xf32, #tpu.memory_space<vmem>>, %arg3: memref<8x12xf32, #tpu.memory_space<vmem>>, %arg4: memref<8x1xf32, #tpu.memory_space<vmem>>, %arg5: memref<1x8x16xf32, #tpu.memory_space<vmem>>) attributes {dimension_semantics = [#tpu.dimension_semantics<parallel>, #tpu.dimension_semantics<parallel>], iteration_bounds = array<i64: 2, 1>, scalar_prefetch = 0 : i64, scratch_operands = 0 : i64, tpu.core_type = #tpu.core_type<tc>, window_params = [{transform_indices = @transform_0, window_bounds = array<i64: 1, 4, 18>}, {pipeline_mode = #tpu.pipeline_mode<synchronous>, transform_indices = @transform_1, window_bounds = array<i64: 8, 12>}, {pipeline_mode = #tpu.pipeline_mode<synchronous>, transform_indices = @transform_2, window_bounds = array<i64: 8, 1>}, {transform_indices = @transform_3, window_bounds = array<i64: 1, 8, 16>}]} {
    %c0 = arith.constant 0 : index
    %c0_0 = arith.constant 0 : index
    %c0_1 = arith.constant 0 : index
    %0 = vector.load %arg2[%c0, %c0_0, %c0_1] : memref<1x4x18xf32, #tpu.memory_space<vmem>>, vector<1x4x16xf32>
    %1 = vector.shape_cast %0 : vector<1x4x16xf32> to vector<4x16xf32>
    %c0_2 = arith.constant 0 : index
    %c0_3 = arith.constant 0 : index
    %c1 = arith.constant 1 : index
    %2 = vector.load %arg2[%c0_2, %c0_3, %c1] : memref<1x4x18xf32, #tpu.memory_space<vmem>>, vector<1x4x16xf32>
    %3 = vector.shape_cast %2 : vector<1x4x16xf32> to vector<4x16xf32>
    %c0_4 = arith.constant 0 : index
    %c0_5 = arith.constant 0 : index
    %c2 = arith.constant 2 : index
    %4 = vector.load %arg2[%c0_4, %c0_5, %c2] : memref<1x4x18xf32, #tpu.memory_space<vmem>>, vector<1x4x16xf32>
    %5 = vector.shape_cast %4 : vector<1x4x16xf32> to vector<4x16xf32>
    %cst = arith.constant 0.000000e+00 : f32
    %6 = vector.broadcast %cst : f32 to vector<8x16xf32>
    %c0_6 = arith.constant 0 : index
    %c0_7 = arith.constant 0 : index
    %7 = vector.load %arg3[%c0_6, %c0_7] : memref<8x12xf32, #tpu.memory_space<vmem>>, vector<8x4xf32>
    %cst_8 = arith.constant dense<0.000000e+00> : vector<8x16xf32>
    %8 = tpu.matmul %7, %1, %cst_8 {dimension_numbers = #tpu.dot_dimension_numbers<[1], [0], [0], [1], [0, 0, 1, 1], [], []>} : vector<8x4xf32>, vector<4x16xf32>, vector<8x16xf32> -> vector<8x16xf32>
    %9 = arith.addf %6, %8 : vector<8x16xf32>
    %c0_9 = arith.constant 0 : index
    %c4 = arith.constant 4 : index
    %10 = vector.load %arg3[%c0_9, %c4] : memref<8x12xf32, #tpu.memory_space<vmem>>, vector<8x4xf32>
    %cst_10 = arith.constant dense<0.000000e+00> : vector<8x16xf32>
    %11 = tpu.matmul %10, %3, %cst_10 {dimension_numbers = #tpu.dot_dimension_numbers<[1], [0], [0], [1], [0, 0, 1, 1], [], []>} : vector<8x4xf32>, vector<4x16xf32>, vector<8x16xf32> -> vector<8x16xf32>
    %12 = arith.addf %9, %11 : vector<8x16xf32>
    %c0_11 = arith.constant 0 : index
    %c8 = arith.constant 8 : index
    %13 = vector.load %arg3[%c0_11, %c8] : memref<8x12xf32, #tpu.memory_space<vmem>>, vector<8x4xf32>
    %cst_12 = arith.constant dense<0.000000e+00> : vector<8x16xf32>
    %14 = tpu.matmul %13, %5, %cst_12 {dimension_numbers = #tpu.dot_dimension_numbers<[1], [0], [0], [1], [0, 0, 1, 1], [], []>} : vector<8x4xf32>, vector<4x16xf32>, vector<8x16xf32> -> vector<8x16xf32>
    %15 = arith.addf %12, %14 : vector<8x16xf32>
    %c0_13 = arith.constant 0 : index
    %c0_14 = arith.constant 0 : index
    %16 = vector.load %arg4[%c0_13, %c0_14] : memref<8x1xf32, #tpu.memory_space<vmem>>, vector<8x1xf32>
    %17 = vector.broadcast %16 : vector<8x1xf32> to vector<8x16xf32>
    %18 = arith.addf %15, %17 : vector<8x16xf32>
    %c0_15 = arith.constant 0 : index
    %c0_16 = arith.constant 0 : index
    %c0_17 = arith.constant 0 : index
    %19 = vector.load %arg5[%c0_15, %c0_16, %c0_17] : memref<1x8x16xf32, #tpu.memory_space<vmem>>, vector<1x8x16xf32>
    %20 = vector.shape_cast %19 : vector<1x8x16xf32> to vector<8x16xf32>
    %21 = vector.shape_cast %18 : vector<8x16xf32> to vector<1x8x16xf32>
    tpu.vector_store %arg5[%c0_15, %c0_16, %c0_17], %21 {strides = array<i32>} : memref<1x8x16xf32, #tpu.memory_space<vmem>>, vector<1x8x16xf32>,
    return
  }
  func.func @transform_0(%arg0: i32, %arg1: i32) -> (i32, i32, i32) {
    %c0_i32 = arith.constant 0 : i32
    %c0_i32_0 = arith.constant 0 : i32
    %c0_i32_1 = arith.constant 0 : i32
    return %arg0, %c0_i32, %c0_i32_0 : i32, i32, i32
  }
  func.func @transform_1(%arg0: i32, %arg1: i32) -> (i32, i32) {
    %c0_i32 = arith.constant 0 : i32
    %c0_i32_0 = arith.constant 0 : i32
    %c0_i32_1 = arith.constant 0 : i32
    return %c0_i32, %c0_i32_0 : i32, i32
  }
  func.func @transform_2(%arg0: i32, %arg1: i32) -> (i32, i32) {
    %c0_i32 = arith.constant 0 : i32
    %c0_i32_0 = arith.constant 0 : i32
    %c0_i32_1 = arith.constant 0 : i32
    return %c0_i32, %c0_i32_0 : i32, i32
  }
  func.func @transform_3(%arg0: i32, %arg1: i32) -> (i32, i32, i32) {
    %c0_i32 = arith.constant 0 : i32
    %c0_i32_0 = arith.constant 0 : i32
    return %arg0, %c0_i32, %arg1 : i32, i32, i32
  }
}

</mosaic_0001>

<bundles_post_ra>
// kernel: tpu_custom_call.1
= control target key start
LH: loop header
LB: loop body
LE: loop exit
PB: predicated region body
PF: predicated region fallthrough
CT: control target
= control target key end

     0   :  { %8 = vsyncpa [#allocation3], 0  ;;  %s723_s0 = inlined_call_operand.vmem [shape: f32[2,4,18], index: 0, kind: input, shape index: {}]   ;;  %s724_s1 = inlined_call_operand.hbm [shape: f32[8,12], index: 1, kind: input, shape index: {}]   ;;  %s725_s2 = inlined_call_operand.vmem [shape: f32[8,1], index: 2, kind: input, shape index: {}]   ;;  %s726_s3 = inlined_call_operand.hbm [shape: f32[2,8,16], index: 3, kind: output, shape index: {}]  }
   0x1   :  { %9 = vsyncpa [#allocation4], 0 }
   0x2   :  { %11 = vsyncpa [#allocation4 + $0x1], 0  ;;  %s620_s12 = smov 0   ;;  %s622_s13 = smov 0  }
   0x3   :  { %s624_s14 = smov 0   ;;  %s626_s15 = smov 0  }
   0x4   :  { %s628_s16 = smov 0   ;;  %s630_s17 = smov 0  }
   0x5 LB: > { %s388_s18 = sadd.s32 4294967295, %s592_s17   ;;  %s389_s19 = sadd.s32 4294967294, %s592_s17   ;;  %s592_s17 = sphi %s630_s17, %s17_s17   ;;  %s588_s16 = sphi %s628_s16, %s733_s16   ;;  %s584_s15 = sphi %s626_s15, %s732_s15   ;;  %s580_s14 = sphi %s624_s14, %s731_s14   ;;  %s576_s13 = sphi %s622_s13, %s730_s13   ;;  %s572_s12 = sphi %s620_s12, %s729_s12  }
   0x6   : > { %s29_s20 = sadd.s32 1, %s588_s16  ;;  %s106_s21 = sadd.s32 1, %s580_s14 }
   0x7   : > { %p31_p0 = scmp.ge.s32.totalorder %s29_s20, 2  ;;  %p116_p1 = scmp.ne.s32.totalorder %s580_s14, %s576_s13 }
   0x8   : > { %p117_p2 = scmp.eq.s32.totalorder %s388_s18, 1  ;;  %p122_p3 = scmp.ne.s32.totalorder %s576_s13, %s572_s12 }
   0x9   : > { %s735_s20 = smov (%p31_p0, %s29_s20), 0  ;;  %p123_p5 = scmp.eq.s32.totalorder %s389_s19, 1 }
   0xa   : > { %p660_p4 = por %p117_p2, %p116_p1  ;;  %s101_s23 = ssub.s32 %s588_s16, %s735_s20 }
   0xb   : > { %p390_p6 = scmp.ge.s32.totalorder %s592_s17, 1  ;;  %p104_p7 = scmp.eq.s32.totalorder %s101_s23, 0 }
   0xc   : > { %p667_p8 = por %p123_p5, %p122_p3  ;;  %p130_p9 = scmp.lt.s32.totalorder %s592_s17, 3 }
   0xd   : > { %s673_s25 = scalar_select %p104_p7, %s580_s14, %s106_s21  }
   0xe   : > { %p131_p10 = pnand %p390_p6, %p130_p9  ;;  %p421_p11 = scmp.eq.s32.totalorder %s388_s18, 0 }
   0xf   : > { %s142_s28 = sshll.u32 %s724_s1, 4  ;;  %s594_s29 = smov [#allocation2]   ;;  %s143_s28 = int_to_ptr.hbm [resolvable:$true] %s142_s28 }
  0x10   : > { %p413_p12 = pneg %p131_p10  ;;  %s144_s30 = sshll.u32 %s594_s29, 4  ;;  %s145_s30 = int_to_ptr.vmem [resolvable:$true] %s144_s30 }
  0x11   : > { %167 = sbr.rel (%p131_p10) target bundleno = 292 (0x124), region = 32 }
  0x12   : > { %p414_p13 = pnand %p421_p11, %p413_p12 }
  0x14   : > { %416 = dma.hbm_to_vmem [thread:$0]  (!%p414_p13), %s143_s28, 128, %s145_s30, [#allocation3]  }
  0x16   : > { %563 = dma.done.wait (%p421_p11), [#allocation3], 128  }
  0x17   : > { %565 = vsyncadd (%p421_p11), [#allocation3], 4294967168  ;;  %p191_p0 = scmp.lt.s32.totalorder %s584_s15, 1  ;;  %s595_s9 = smov 126   ;;  %v196_v1 = vld [vmem:[#allocation2] sm:$0xff]  ;;  %vm206_vm0 = vcmask 1043456  }
  0x18   : > { %s596_s10 = smov 127   ;;  %s597_s11 = smov 120   ;;  %vm203_vm1 = vcmask 31744   ;;  %v282_v2 = vld [vmem:[%s725_s2] sm:$0xff]  ;;  %v599_v3 = vmov 0   ;;  %vm289_vm2 = vcmask 130048  }
  0x19   : > { %s192_s4 = scalar_select %p191_p0, %s584_s15, 1  ;;  %478 = vset.pattern.permute.xlu2 %v599_v3  ;;  %479 = vset.pattern.permute.xlu0 %v599_v3 }
  0x1a   : > { %s598_s18 = smov 124   ;;  %285 = vperm.xlu2 %478, %v282_v2   ;;  %s188_s23 = sand.u32 1, %s576_s13  }
  0x1b   : > { %s396_s5 = sshll.u32 %s192_s4, 2  ;;  %s395_s26 = sshll.u32 %s188_s23, 3 }
  0x1c   : > { %s194_s8 = scalar_lea.vmem %s723_s0, %s396_s5  ;;  %s404_s27 = sshll.u32 %s584_s15, 3 }
  0x1d   : > { %v195_v0 = vld [vmem:[%s194_s8] sm:$0xf]  ;;  %s303_s30 = scalar_lea.hbm %s726_s3, %s404_s27  ;;  %s190_s4 = scalar_lea.vmem [#allocation5], %s395_s26 }
  0x1e   : > { %255 = vrot.lane.b32.xlu0 %v195_v0, %s595_s9  ;;  %201 = vrot.lane.b32.xlu1 %v195_v0, %s596_s10  ;;  %s305_s5 = sshll.u32 %s190_s4, 4  ;;  %s307_s6 = sshll.u32 %s303_s30, 4  ;;  %s306_s5 = int_to_ptr.vmem [resolvable:$true] %s305_s5  ;;  %s308_s6 = int_to_ptr.hbm [resolvable:$true] %s307_s6 }
  0x1f   : > { %399 = vmatpush.msk.msra.mxu1 %vm206_vm0, %v195_v0  ;;  %s292_s7 = scalar_lea.sflag [#allocation4], %s188_s23  ;;  %s524_s8 = sshra.s32 %s308_s6, 4  ;;  %s525_s8 = int_to_ptr.hbm [resolvable:$true] %s524_s8 }
  0x20   : > { %400 = vmatmul.msk.f32.vlgmr.msra.gmra.mxu1 %vm203_vm1, %v196_v1  ;;  %s526_s15 = scalar_lea.hbm %s525_s8, 8  ;;  %p531_p5 = scmp.lt.s32.totalorder %s525_s8, %s726_s3 }
  0x21   : > { %p527_p1 = scmp.ne.s32.totalorder %s525_s8, %s526_s15 }
  0x23   : > { %p528_p2 = pnand %p527_p1, %p660_p4 }
  0x25   : > { %p529_p3 = pneg %p528_p2 }
  0x26   : > { %253 = vrot.lane.b32.xlu0 %v196_v1, %s597_s11  ;;  %198 = vrot.lane.b32.xlu1 %v196_v1, %s598_s18  ;;  %s530_s11 = scalar_lea.hbm %s726_s3, 16 }
  0x27   : > { %p532_p6 = scmp.lt.s32.totalorder %s530_s11, %s526_s15 }
  0x29   : > { %p533_p7 = por %p532_p6, %p531_p5 }
  0x2b   : > { %p534_p9 = pnand %p533_p7, %p529_p3 }
  0x74   : > { %v286_v12 = vpop.permute.xlu2 %285 }
  0x90   : > { %v256_v4 = vpop.permute.xlu0 %255  ;;  %v202_v5 = vpop.permute.xlu1 %201 }
  0x91   : > { %401 = vmatpush.msk.msra.mxu2 %vm206_vm0, %v256_v4  ;;  %397 = vmatpush.msk.msra.mxu0 %vm206_vm0, %v202_v5 }
  0x98   : > { %v254_v6 = vpop.permute.xlu0 %253  ;;  %v199_v7 = vpop.permute.xlu1 %198 }
  0x99   : > { %402 = vmatmul.msk.f32.vlgmr.msra.gmra.mxu2 %vm203_vm1, %v254_v6  ;;  %398 = vmatmul.msk.f32.vlgmr.msra.gmra.mxu0 %vm203_vm1, %v199_v7 }
  0x9d   : > { %v250_v9 = vpop.f32.mrf.mxu1 }
 0x116   : > { %v226_v8 = vpop.f32.mrf.mxu0 }
 0x117   : > { %v251_v10 = vadd.f32 %v250_v9, %v226_v8 }
 0x11c   : > { %v278_v11 = vpop.f32.mrf.mxu2 }
 0x11d   : > { %v281_v13 = vadd.f32 %v278_v11, %v251_v10 }
 0x11f   : > { %v288_v14 = vadd.f32 %v286_v12, %v281_v13 }
 0x121   : > { %290 = vst.msk [vmem:[%s190_s4] sm:$0xff] %vm289_vm2, %v288_v14 }
 0x122   : > { %537 = shalt.err (!%p534_p9)
}
 0x123   : > { %411 = dma.vmem_to_hbm [thread:$0]  (%p660_p4), %s306_s5, 128, %s308_s6, %s292_s7  }
 0x124 PF: > { %p423_p10 = scmp.ge.s32.totalorder %s592_s17, 2  ;;  %s319_s21 = sand.u32 1, %s572_s12  }
 0x125   : > { %s320_s23 = scalar_lea.sflag [#allocation4], %s319_s21 }
 0x126   : > { %p418_p11 = pnand %p423_p10, %p667_p8 }
 0x128   : > { %p419_p12 = pneg %p418_p11 }
 0x12a   : > { %567 = dma.done.wait (%p419_p12), %s320_s23, 128  }
 0x12b   : > { %569 = vsyncadd (%p419_p12), %s320_s23, 4294967168  ;;  %s17_s17 = sadd.s32 1, %s592_s17   ;;  %s729_s12 = smov %s576_s13 }
 0x12c   : > { %p14_p13 = scmp.ge.s32.totalorder %s17_s17, 4   ;;  %s730_s13 = smov %s580_s14 }
 0x12d   : > { %s731_s14 = smov %s673_s25  ;;  %s732_s15 = smov %s588_s16 }
 0x12e   : > { %s733_s16 = smov %s735_s20  ;;  %16 = sbr.rel (!%p14_p13) target bundleno = 5 (0x5), region = 72 }
 0x133   :  { %326 = vsyncpa [#allocation3], 1 }
 0x134   :  { %328 = vsyncpa [#allocation3 + $0x1], 1 }
 0x135   :  { %329 = vsyncpa [#allocation4], 1 }
 0x136   :  { %331 = vsyncpa [#allocation4 + $0x1], 1 }

</bundles_post_ra>
